<compile_context>
chip_gen: v7x
topology: tpu7x:2x2x1
jax: 0.10.0
libtpu: 0.0.40
codegen_flags: <defaults>
</compile_context>

<pallas_src>
import functools

import jax
import jax.numpy as jnp
from jax.experimental import pallas as pl
from jax.experimental.pallas import tpu as pltpu

_MIB = 1024 * 1024
# Original nn.Linear (fan_in, fan_out) per layer — used for exact FLOP count.
_LAYER_DIMS = [(320, 64), (64, 64), (64, 8), (8, 64), (64, 64), (64, 320)]
_FLOPS_PER_ROW = 2 * sum(i * o for i, o in _LAYER_DIMS)


def _ae_kernel(x_ref,
               w1, b1, w2, b2, w3, b3,
               w4, b4, w5, b5, w6, b6,
               o_ref, *, compute_dtype):
    # Entire forward pass for one batch tile, all operands resident in VMEM.
    x = x_ref[...]

    def lin(h, w, b, relu=True):
        # Optionally bf16 matmul operands; accumulation / bias / ReLU stay f32.
        y = jnp.dot(h.astype(compute_dtype), w[...].astype(compute_dtype),
                    preferred_element_type=jnp.float32) + b[...]
        return jnp.maximum(y, 0.0) if relu else y

    h = lin(x, w1, b1)               # (tb, 64)   encoder 1
    h = lin(h, w2, b2)               # (tb, 64)   encoder 2
    h = lin(h, w3, b3)               # (tb, 128)  encoder 3 (bottleneck, 8->128 zero-pad)
    h = lin(h, w4, b4)               # (tb, 64)   decoder 1
    h = lin(h, w5, b5)               # (tb, 64)   decoder 2
    y = lin(h, w6, b6, relu=False)   # (tb, 320)  decoder 3 (no ReLU)
    o_ref[...] = y.astype(o_ref.dtype)


def _tpu_caps():
    """Best-effort hardware query: (per-core VMEM bytes, multi-TensorCore?)."""
    vmem_cap = 128 * _MIB
    cores = 1
    try:
        info = pltpu.get_tpu_info()
        vmem_cap = int(getattr(info, "vmem_capacity_bytes", vmem_cap))
        for attr in ("num_cores", "core_count", "num_tensorcores"):
            v = getattr(info, attr, None)
            if v:
                cores = int(v)
                break
    except Exception:
        pass
    # 64 MiB/TC VMEM is the v7x signature (2 TCs/chip); v5e/v6e have 128 MiB, 1 TC.
    multi_core = cores > 1 or vmem_cap <= 80 * _MIB
    return vmem_cap, multi_core


def _vmem_need(tb, weight_bytes):
    io = 2 * (2 * tb * 320 * 4)                                    # double-buffered in+out tiles
    act = tb * (320 + 64 + 64 + 128 + 64 + 64 + 320) * 4           # live activations
    return io + act + weight_bytes


def _round8(n):
    return max(8, -(-int(n) // 8) * 8)


def _pick_tile(B, tb_max, vmem_budget, weight_bytes, multi_core):
    """Largest batch tile (multiple of 8) that fits the scoped-VMEM budget.
    Only on multi-TC (v7x-class) chips do we force >=2 grid steps, and never
    below a 256-row floor; single-TC chips get one maximal tile."""
    tb = _round8(min(tb_max, _round8(B)))
    while tb > 8 and _vmem_need(tb, weight_bytes) > vmem_budget:
        tb = _round8(tb // 2)
    if multi_core and pl.cdiv(B, tb) < 2 and B >= 2 * 256:
        tb = _round8(-(-B // 2))
    return tb


def prepare_weights(params, weight_dtype=jnp.float32):
    """Pad the 8-wide bottleneck to 128 lanes once (not per forward call).
    Weight matrices may be cast (e.g. bf16 for v5e); biases stay f32 since
    they are added to the f32 accumulator."""
    (w1, b1), (w2, b2), (w3, b3), (w4, b4), (w5, b5), (w6, b6) = params
    w3p = jnp.pad(w3, ((0, 0), (0, 128 - w3.shape[1])))
    b3p = jnp.pad(b3, ((0, 0), (0, 128 - b3.shape[1])))
    w4p = jnp.pad(w4, ((0, 128 - w4.shape[0]), (0, 0)))
    flat = [w1, b1, w2, b2, w3p, b3p, w4p, b4, w5, b5, w6, b6]
    out = []
    for i, a in enumerate(flat):
        out.append(a.astype(weight_dtype if i % 2 == 0 else jnp.float32))
    return out


def ae_forward(x, weights, *, tb=2048, compute_dtype=jnp.float32):
    """x: (B, 320) float32. weights: flat list from prepare_weights()."""
    B, f_in = x.shape
    assert f_in == 320

    weight_bytes = sum(int(a.size) * a.dtype.itemsize for a in weights)
    vmem_cap, multi_core = _tpu_caps()
    # Scoped-VMEM ceiling: leave headroom on v7x's 64 MiB/TC; v5e/v6e have 128 MiB.
    scoped_cap = 44 * _MIB if vmem_cap <= 80 * _MIB else 96 * _MIB

    tb = _pick_tile(B, tb, int(0.8 * scoped_cap), weight_bytes, multi_core)
    B_pad = pl.cdiv(B, tb) * tb
    if B_pad != B:
        x = jnp.pad(x, ((0, B_pad - B), (0, 0)))
    grid = (B_pad // tb,)

    # Weights/biases: whole-array VMEM residents (constant across the grid ->
    # loaded once; no per-step double-buffering or DMA descriptors for them).
    weight_spec = pl.BlockSpec(memory_space=pltpu.MemorySpace.VMEM)
    in_specs = [pl.BlockSpec((tb, 320), lambda i: (i, 0))] + [weight_spec] * len(weights)

    cost = pl.CostEstimate(
        flops=int(_FLOPS_PER_ROW * B_pad),
        transcendentals=0,
        bytes_accessed=int(2 * B_pad * 320 * 4 + weight_bytes),
    )

    vmem_need = _vmem_need(tb, weight_bytes)
    vmem_limit = int(min(scoped_cap, max(32 * _MIB, 2 * vmem_need)))

    kernel = functools.partial(_ae_kernel, compute_dtype=compute_dtype)

    def build(dim_sem):
        return pl.pallas_call(
            kernel,
            out_shape=jax.ShapeDtypeStruct((B_pad, 320), jnp.float32),
            grid_spec=pltpu.PrefetchScalarGridSpec(
                num_scalar_prefetch=0,
                grid=grid,
                in_specs=in_specs,
                out_specs=pl.BlockSpec((tb, 320), lambda i: (i, 0)),
            ),
            compiler_params=pltpu.CompilerParams(
                dimension_semantics=dim_sem, vmem_limit_bytes=vmem_limit),
            cost_estimate=cost,
        )

    if multi_core and grid[0] >= 2:
        # Only CORE_PARALLEL actually shards grid steps across v7x's two TCs.
        try:
            out = jax.block_until_ready(build((pltpu.CORE_PARALLEL,))(x, *weights))
        except Exception:
            out = build(("parallel",))(x, *weights)
    else:
        out = build(("parallel",))(x, *weights)

    return out[:B] if B_pad != B else out


def init_params(key):
    """Deterministic init mirroring nn.Linear (out,in)/(out,) shapes, returned
    pre-transposed as (in, out) weights and (1, out) biases."""
    params = []
    for fan_in, fan_out in _LAYER_DIMS:
        kw, kb, key = jax.random.split(key, 3)
        bound = 1.0 / jnp.sqrt(fan_in)
        w_t = jax.random.uniform(kw, (fan_in, fan_out), jnp.float32, -bound, bound)
        b = jax.random.uniform(kb, (1, fan_out), jnp.float32, -bound, bound)
        params.append((w_t, b))
    return params


def reference_forward(x, params):
    h = x
    for idx, (w, b) in enumerate(params):
        h = h @ w + b
        if idx < len(params) - 1:
            h = jnp.maximum(h, 0.0)
    return h


if __name__ == "__main__":
    key = jax.random.PRNGKey(0)
    kx1, kx2, kx3, kp = jax.random.split(key, 4)
    params = init_params(kp)
    weights = prepare_weights(params)   # bottleneck padding done once here

    # Small single-tile batch.
    B = 64
    x = jax.random.normal(kx1, (B, 320), jnp.float32)
    out = jax.block_until_ready(ae_forward(x, weights))
    ref = reference_forward(x, params)
    assert out.shape == (B, 320)
    assert jnp.allclose(out, ref, atol=1e-4, rtol=1e-4), "mismatch vs reference (B=64)"

    # Ragged batch (exercises batch zero-pad + output slice).
    B2 = 20
    x2 = jax.random.normal(kx2, (B2, 320), jnp.float32)
    out2 = jax.block_until_ready(ae_forward(x2, weights))
    ref2 = reference_forward(x2, params)
    assert out2.shape == (B2, 320)
    assert jnp.allclose(out2, ref2, atol=1e-4, rtol=1e-4), "mismatch vs reference (B=20)"

    # Multi-grid-step path (exercises the pipelined tile loop: 3 steps of 128).
    B3 = 300
    x3 = jax.random.normal(kx3, (B3, 320), jnp.float32)
    out3 = jax.block_until_ready(ae_forward(x3, weights, tb=128))
    ref3 = reference_forward(x3, params)
    assert out3.shape == (B3, 320)
    assert jnp.allclose(out3, ref3, atol=1e-4, rtol=1e-4), "mismatch vs reference (B=300)"

    print("KERNEL_OK")
</pallas_src>

<mosaic_0001>
module attributes {stable_mosaic.version = 11 : i64} {
  func.func @_ae_kernel(%arg0: i32, %arg1: memref<64x320xf32, #tpu.memory_space<vmem>>, %arg2: memref<320x64xf32, #tpu.memory_space<vmem>>, %arg3: memref<1x64xf32, #tpu.memory_space<vmem>>, %arg4: memref<64x64xf32, #tpu.memory_space<vmem>>, %arg5: memref<1x64xf32, #tpu.memory_space<vmem>>, %arg6: memref<64x128xf32, #tpu.memory_space<vmem>>, %arg7: memref<1x128xf32, #tpu.memory_space<vmem>>, %arg8: memref<128x64xf32, #tpu.memory_space<vmem>>, %arg9: memref<1x64xf32, #tpu.memory_space<vmem>>, %arg10: memref<64x64xf32, #tpu.memory_space<vmem>>, %arg11: memref<1x64xf32, #tpu.memory_space<vmem>>, %arg12: memref<64x320xf32, #tpu.memory_space<vmem>>, %arg13: memref<1x320xf32, #tpu.memory_space<vmem>>, %arg14: memref<64x320xf32, #tpu.memory_space<vmem>>) attributes {dimension_semantics = [#tpu.dimension_semantics<parallel>], iteration_bounds = array<i64: 1>, scalar_prefetch = 0 : i64, scratch_operands = 0 : i64, tpu.core_type = #tpu.core_type<tc>, window_params = [{transform_indices = @transform_0, window_bounds = array<i64: 64, 320>}, {pipeline_mode = #tpu.pipeline_mode<synchronous>, transform_indices = @transform_1, window_bounds = array<i64: 320, 64>}, {pipeline_mode = #tpu.pipeline_mode<synchronous>, transform_indices = @transform_2, window_bounds = array<i64: 1, 64>}, {pipeline_mode = #tpu.pipeline_mode<synchronous>, transform_indices = @transform_3, window_bounds = array<i64: 64, 64>}, {pipeline_mode = #tpu.pipeline_mode<synchronous>, transform_indices = @transform_4, window_bounds = array<i64: 1, 64>}, {pipeline_mode = #tpu.pipeline_mode<synchronous>, transform_indices = @transform_5, window_bounds = array<i64: 64, 128>}, {pipeline_mode = #tpu.pipeline_mode<synchronous>, transform_indices = @transform_6, window_bounds = array<i64: 1, 128>}, {pipeline_mode = #tpu.pipeline_mode<synchronous>, transform_indices = @transform_7, window_bounds = array<i64: 128, 64>}, {pipeline_mode = #tpu.pipeline_mode<synchronous>, transform_indices = @transform_8, window_bounds = array<i64: 1, 64>}, {pipeline_mode = #tpu.pipeline_mode<synchronous>, transform_indices = @transform_9, window_bounds = array<i64: 64, 64>}, {pipeline_mode = #tpu.pipeline_mode<synchronous>, transform_indices = @transform_10, window_bounds = array<i64: 1, 64>}, {pipeline_mode = #tpu.pipeline_mode<synchronous>, transform_indices = @transform_11, window_bounds = array<i64: 64, 320>}, {pipeline_mode = #tpu.pipeline_mode<synchronous>, transform_indices = @transform_12, window_bounds = array<i64: 1, 320>}, {transform_indices = @transform_13, window_bounds = array<i64: 64, 320>}]} {
    %c0 = arith.constant 0 : index
    %c0_0 = arith.constant 0 : index
    %0 = vector.load %arg1[%c0, %c0_0] : memref<64x320xf32, #tpu.memory_space<vmem>>, vector<64x320xf32>
    %c0_1 = arith.constant 0 : index
    %c0_2 = arith.constant 0 : index
    %1 = vector.load %arg2[%c0_1, %c0_2] : memref<320x64xf32, #tpu.memory_space<vmem>>, vector<320x64xf32>
    %cst = arith.constant dense<0.000000e+00> : vector<64x64xf32>
    %2 = tpu.matmul %0, %1, %cst {dimension_numbers = #tpu.dot_dimension_numbers<[1], [0], [0], [1], [0, 0, 1, 1], [], []>} : vector<64x320xf32>, vector<320x64xf32>, vector<64x64xf32> -> vector<64x64xf32>
    %c0_3 = arith.constant 0 : index
    %c0_4 = arith.constant 0 : index
    %3 = vector.load %arg3[%c0_3, %c0_4] : memref<1x64xf32, #tpu.memory_space<vmem>>, vector<1x64xf32>
    %4 = vector.broadcast %3 : vector<1x64xf32> to vector<64x64xf32>
    %5 = arith.addf %2, %4 : vector<64x64xf32>
    %cst_5 = arith.constant 0.000000e+00 : f32
    %6 = vector.broadcast %cst_5 : f32 to vector<64x64xf32>
    %7 = arith.maximumf %5, %6 : vector<64x64xf32>
    %c0_6 = arith.constant 0 : index
    %c0_7 = arith.constant 0 : index
    %8 = vector.load %arg4[%c0_6, %c0_7] : memref<64x64xf32, #tpu.memory_space<vmem>>, vector<64x64xf32>
    %cst_8 = arith.constant dense<0.000000e+00> : vector<64x64xf32>
    %9 = tpu.matmul %7, %8, %cst_8 {dimension_numbers = #tpu.dot_dimension_numbers<[1], [0], [0], [1], [0, 0, 1, 1], [], []>} : vector<64x64xf32>, vector<64x64xf32>, vector<64x64xf32> -> vector<64x64xf32>
    %c0_9 = arith.constant 0 : index
    %c0_10 = arith.constant 0 : index
    %10 = vector.load %arg5[%c0_9, %c0_10] : memref<1x64xf32, #tpu.memory_space<vmem>>, vector<1x64xf32>
    %11 = vector.broadcast %10 : vector<1x64xf32> to vector<64x64xf32>
    %12 = arith.addf %9, %11 : vector<64x64xf32>
    %cst_11 = arith.constant 0.000000e+00 : f32
    %13 = vector.broadcast %cst_11 : f32 to vector<64x64xf32>
    %14 = arith.maximumf %12, %13 : vector<64x64xf32>
    %c0_12 = arith.constant 0 : index
    %c0_13 = arith.constant 0 : index
    %15 = vector.load %arg6[%c0_12, %c0_13] : memref<64x128xf32, #tpu.memory_space<vmem>>, vector<64x128xf32>
    %cst_14 = arith.constant dense<0.000000e+00> : vector<64x128xf32>
    %16 = tpu.matmul %14, %15, %cst_14 {dimension_numbers = #tpu.dot_dimension_numbers<[1], [0], [0], [1], [0, 0, 1, 1], [], []>} : vector<64x64xf32>, vector<64x128xf32>, vector<64x128xf32> -> vector<64x128xf32>
    %c0_15 = arith.constant 0 : index
    %c0_16 = arith.constant 0 : index
    %17 = vector.load %arg7[%c0_15, %c0_16] : memref<1x128xf32, #tpu.memory_space<vmem>>, vector<1x128xf32>
    %18 = vector.broadcast %17 : vector<1x128xf32> to vector<64x128xf32>
    %19 = arith.addf %16, %18 : vector<64x128xf32>
    %cst_17 = arith.constant 0.000000e+00 : f32
    %20 = vector.broadcast %cst_17 : f32 to vector<64x128xf32>
    %21 = arith.maximumf %19, %20 : vector<64x128xf32>
    %c0_18 = arith.constant 0 : index
    %c0_19 = arith.constant 0 : index
    %22 = vector.load %arg8[%c0_18, %c0_19] : memref<128x64xf32, #tpu.memory_space<vmem>>, vector<128x64xf32>
    %cst_20 = arith.constant dense<0.000000e+00> : vector<64x64xf32>
    %23 = tpu.matmul %21, %22, %cst_20 {dimension_numbers = #tpu.dot_dimension_numbers<[1], [0], [0], [1], [0, 0, 1, 1], [], []>} : vector<64x128xf32>, vector<128x64xf32>, vector<64x64xf32> -> vector<64x64xf32>
    %c0_21 = arith.constant 0 : index
    %c0_22 = arith.constant 0 : index
    %24 = vector.load %arg9[%c0_21, %c0_22] : memref<1x64xf32, #tpu.memory_space<vmem>>, vector<1x64xf32>
    %25 = vector.broadcast %24 : vector<1x64xf32> to vector<64x64xf32>
    %26 = arith.addf %23, %25 : vector<64x64xf32>
    %cst_23 = arith.constant 0.000000e+00 : f32
    %27 = vector.broadcast %cst_23 : f32 to vector<64x64xf32>
    %28 = arith.maximumf %26, %27 : vector<64x64xf32>
    %c0_24 = arith.constant 0 : index
    %c0_25 = arith.constant 0 : index
    %29 = vector.load %arg10[%c0_24, %c0_25] : memref<64x64xf32, #tpu.memory_space<vmem>>, vector<64x64xf32>
    %cst_26 = arith.constant dense<0.000000e+00> : vector<64x64xf32>
    %30 = tpu.matmul %28, %29, %cst_26 {dimension_numbers = #tpu.dot_dimension_numbers<[1], [0], [0], [1], [0, 0, 1, 1], [], []>} : vector<64x64xf32>, vector<64x64xf32>, vector<64x64xf32> -> vector<64x64xf32>
    %c0_27 = arith.constant 0 : index
    %c0_28 = arith.constant 0 : index
    %31 = vector.load %arg11[%c0_27, %c0_28] : memref<1x64xf32, #tpu.memory_space<vmem>>, vector<1x64xf32>
    %32 = vector.broadcast %31 : vector<1x64xf32> to vector<64x64xf32>
    %33 = arith.addf %30, %32 : vector<64x64xf32>
    %cst_29 = arith.constant 0.000000e+00 : f32
    %34 = vector.broadcast %cst_29 : f32 to vector<64x64xf32>
    %35 = arith.maximumf %33, %34 : vector<64x64xf32>
    %c0_30 = arith.constant 0 : index
    %c0_31 = arith.constant 0 : index
    %36 = vector.load %arg12[%c0_30, %c0_31] : memref<64x320xf32, #tpu.memory_space<vmem>>, vector<64x320xf32>
    %cst_32 = arith.constant dense<0.000000e+00> : vector<64x320xf32>
    %37 = tpu.matmul %35, %36, %cst_32 {dimension_numbers = #tpu.dot_dimension_numbers<[1], [0], [0], [1], [0, 0, 1, 1], [], []>} : vector<64x64xf32>, vector<64x320xf32>, vector<64x320xf32> -> vector<64x320xf32>
    %c0_33 = arith.constant 0 : index
    %c0_34 = arith.constant 0 : index
    %38 = vector.load %arg13[%c0_33, %c0_34] : memref<1x320xf32, #tpu.memory_space<vmem>>, vector<1x320xf32>
    %39 = vector.broadcast %38 : vector<1x320xf32> to vector<64x320xf32>
    %40 = arith.addf %37, %39 : vector<64x320xf32>
    %c0_35 = arith.constant 0 : index
    %c0_36 = arith.constant 0 : index
    %41 = vector.load %arg14[%c0_35, %c0_36] : memref<64x320xf32, #tpu.memory_space<vmem>>, vector<64x320xf32>
    tpu.vector_store %arg14[%c0_35, %c0_36], %40 {strides = array<i32>} : memref<64x320xf32, #tpu.memory_space<vmem>>, vector<64x320xf32>,
    return
  }
  func.func @transform_0(%arg0: i32) -> (i32, i32) {
    %c0_i32 = arith.constant 0 : i32
    %c0_i32_0 = arith.constant 0 : i32
    return %arg0, %c0_i32 : i32, i32
  }
  func.func @transform_1(%arg0: i32) -> (i32, i32) {
    %c0_i32 = arith.constant 0 : i32
    %c0_i32_0 = arith.constant 0 : i32
    %c0_i32_1 = arith.constant 0 : i32
    return %c0_i32, %c0_i32_0 : i32, i32
  }
  func.func @transform_2(%arg0: i32) -> (i32, i32) {
    %c0_i32 = arith.constant 0 : i32
    %c0_i32_0 = arith.constant 0 : i32
    %c0_i32_1 = arith.constant 0 : i32
    return %c0_i32, %c0_i32_0 : i32, i32
  }
  func.func @transform_3(%arg0: i32) -> (i32, i32) {
    %c0_i32 = arith.constant 0 : i32
    %c0_i32_0 = arith.constant 0 : i32
    %c0_i32_1 = arith.constant 0 : i32
    return %c0_i32, %c0_i32_0 : i32, i32
  }
  func.func @transform_4(%arg0: i32) -> (i32, i32) {
    %c0_i32 = arith.constant 0 : i32
    %c0_i32_0 = arith.constant 0 : i32
    %c0_i32_1 = arith.constant 0 : i32
    return %c0_i32, %c0_i32_0 : i32, i32
  }
  func.func @transform_5(%arg0: i32) -> (i32, i32) {
    %c0_i32 = arith.constant 0 : i32
    %c0_i32_0 = arith.constant 0 : i32
    %c0_i32_1 = arith.constant 0 : i32
    return %c0_i32, %c0_i32_0 : i32, i32
  }
  func.func @transform_6(%arg0: i32) -> (i32, i32) {
    %c0_i32 = arith.constant 0 : i32
    %c0_i32_0 = arith.constant 0 : i32
    %c0_i32_1 = arith.constant 0 : i32
    return %c0_i32, %c0_i32_0 : i32, i32
  }
  func.func @transform_7(%arg0: i32) -> (i32, i32) {
    %c0_i32 = arith.constant 0 : i32
    %c0_i32_0 = arith.constant 0 : i32
    %c0_i32_1 = arith.constant 0 : i32
    return %c0_i32, %c0_i32_0 : i32, i32
  }
  func.func @transform_8(%arg0: i32) -> (i32, i32) {
    %c0_i32 = arith.constant 0 : i32
    %c0_i32_0 = arith.constant 0 : i32
    %c0_i32_1 = arith.constant 0 : i32
    return %c0_i32, %c0_i32_0 : i32, i32
  }
  func.func @transform_9(%arg0: i32) -> (i32, i32) {
    %c0_i32 = arith.constant 0 : i32
    %c0_i32_0 = arith.constant 0 : i32
    %c0_i32_1 = arith.constant 0 : i32
    return %c0_i32, %c0_i32_0 : i32, i32
  }
  func.func @transform_10(%arg0: i32) -> (i32, i32) {
    %c0_i32 = arith.constant 0 : i32
    %c0_i32_0 = arith.constant 0 : i32
    %c0_i32_1 = arith.constant 0 : i32
    return %c0_i32, %c0_i32_0 : i32, i32
  }
  func.func @transform_11(%arg0: i32) -> (i32, i32) {
    %c0_i32 = arith.constant 0 : i32
    %c0_i32_0 = arith.constant 0 : i32
    %c0_i32_1 = arith.constant 0 : i32
    return %c0_i32, %c0_i32_0 : i32, i32
  }
  func.func @transform_12(%arg0: i32) -> (i32, i32) {
    %c0_i32 = arith.constant 0 : i32
    %c0_i32_0 = arith.constant 0 : i32
    %c0_i32_1 = arith.constant 0 : i32
    return %c0_i32, %c0_i32_0 : i32, i32
  }
  func.func @transform_13(%arg0: i32) -> (i32, i32) {
    %c0_i32 = arith.constant 0 : i32
    %c0_i32_0 = arith.constant 0 : i32
    return %arg0, %c0_i32 : i32, i32
  }
}

</mosaic_0001>

<bundles_post_ra>
// kernel: tpu_custom_call.1
= control target key start
LH: loop header
LB: loop body
LE: loop exit
PB: predicated region body
PF: predicated region fallthrough
CT: control target
= control target key end

     0   :  { %18 = vsyncpa [#allocation3], 0  ;;  %s2466_s0 = inlined_call_operand.vmem [shape: f32[64,320], index: 0, kind: input, shape index: {}]   ;;  %s2467_s1 = inlined_call_operand.vmem [shape: f32[320,64], index: 1, kind: input, shape index: {}]   ;;  %s2468_s2 = inlined_call_operand.vmem [shape: f32[1,64], index: 2, kind: input, shape index: {}]   ;;  %s2469_s3 = inlined_call_operand.vmem [shape: f32[64,64], index: 3, kind: input, shape index: {}]   ;;  %s2470_s4 = inlined_call_operand.vmem [shape: f32[1,64], index: 4, kind: input, shape index: {}]   ;;  %s2471_s5 = inlined_call_operand.vmem [shape: f32[64,128], index: 5, kind: input, shape index: {}]   ;;  %s2472_s6 = inlined_call_operand.vmem [shape: f32[1,128], index: 6, kind: input, shape index: {}]   ;;  %s2473_s7 = inlined_call_operand.vmem [shape: f32[128,64], index: 7, kind: input, shape index: {}]   ;;  %s2474_s8 = inlined_call_operand.vmem [shape: f32[1,64], index: 8, kind: input, shape index: {}]   ;;  %s2475_s9 = inlined_call_operand.hbm [shape: f32[64,64], index: 9, kind: input, shape index: {}]   ;;  %s2476_s10 = inlined_call_operand.vmem [shape: f32[1,64], index: 10, kind: input, shape index: {}]   ;;  %s2477_s11 = inlined_call_operand.vmem [shape: f32[64,320], index: 11, kind: input, shape index: {}]   ;;  %s2478_s12 = inlined_call_operand.vmem [shape: f32[1,320], index: 12, kind: input, shape index: {}]   ;;  %s2479_s13 = inlined_call_operand.hbm [shape: f32[64,320], index: 13, kind: output, shape index: {}]  }
   0x1   :  { %19 = vsyncpa [#allocation4], 0  ;;  %s1901_s25 = smov [#allocation2]   ;;  %s1853_s29 = scalar_lea.hbm %s2475_s9, 1024 }
   0x2   :  { %s43_s26 = sshll.u32 %s1901_s25, 4  ;;  %p1854_p0 = scmp.ne.s32.totalorder %s2475_s9, %s1853_s29  ;;  %s44_s26 = int_to_ptr.vmem [resolvable:$true] %s43_s26 }
   0x3   :  { %p1857_p1 = scmp.lt.u32.totalorder %s1853_s29, %s2475_s9 }
   0x5   :  { %p1859_p2 = pnand %p1857_p1, %p1854_p0 }
   0x7   :  { %1862 = shalt.err (!%p1859_p2)
}
   0x8   :  { %s1863_s17 = scalar_lea.vmem %s44_s26, 1024  ;;  %p1868_p4 = scmp.lt.s32.totalorder %s44_s26, %s44_s26 }
   0x9   :  { %p1864_p3 = scmp.ne.s32.totalorder %s44_s26, %s1863_s17  ;;  %p1869_p5 = scmp.lt.s32.totalorder %s1863_s17, %s1863_s17 }
   0xb   :  { %p1870_p6 = por %p1869_p5, %p1868_p4 }
   0xd   :  { %p1871_p7 = pnand %p1870_p6, %p1864_p3 }
   0xf   :  { %1874 = shalt.err (!%p1871_p7)
}
  0x10   :  { %s1902_s18 = smov 128   ;;  %s1903_s19 = smov 8  }
  0x11   :  { %49 = dma.hbm_to_vmem [thread:$0]  %s2475_s9, 1024, %s44_s26, [#allocation3], %s1902_s18, %s1902_s18, %s1903_s19  }
  0x12   :  { %1897 = dma.done.wait [#allocation3], 1024  }
  0x13   :  { %1898 = vsyncadd [#allocation3], 4294966272  ;;  %v99_v0 = vld [vmem:[%s2467_s1 + $0x80] sm:$0xff]  ;;  %v100_v1 = vld [vmem:[%s2467_s1 + $0x88] sm:$0xff]  ;;  %vm130_vm0 = vcmask 523264  }
  0x14   :  { %v83_v2 = vld [vmem:[%s2467_s1] sm:$0xff]  ;;  %v1686_v3 = vpack.c.bf16 %v100_v1, %v99_v0  ;;  %v84_v4 = vld [vmem:[%s2467_s1 + $0x8] sm:$0xff]  ;;  %v101_v5 = vld [vmem:[%s2467_s1 + $0x90] sm:$0xff] }
  0x15   :  { %v102_v6 = vld [vmem:[%s2467_s1 + $0x98] sm:$0xff]  ;;  %v1688_v7 = vpack.c.bf16 %v84_v4, %v83_v2  ;;  %v85_v9 = vld [vmem:[%s2467_s1 + $0x10] sm:$0xff]  ;;  %v103_v11 = vld [vmem:[%s2467_s1 + $0xa0] sm:$0xff] }
  0x16   :  { %v1690_v8 = vpack.c.bf16 %v102_v6, %v101_v5  ;;  %v86_v10 = vld [vmem:[%s2467_s1 + $0x18] sm:$0xff]  ;;  %1687 = vmatprep.subr.bf16.mxu0 %v1686_v3  ;;  %v104_v12 = vld [vmem:[%s2467_s1 + $0xa8] sm:$0xff]  ;;  %v87_v15 = vld [vmem:[%s2467_s1 + $0x20] sm:$0xff] }
  0x17   :  { %1689 = vmatpush3.bf16.msra.mxu0 %v1688_v7  ;;  %v1692_v13 = vpack.c.bf16 %v86_v10, %v85_v9  ;;  %v1694_v14 = vpack.c.bf16 %v104_v12, %v103_v11  ;;  %v88_v16 = vld [vmem:[%s2467_s1 + $0x28] sm:$0xff]  ;;  %v105_v17 = vld [vmem:[%s2467_s1 + $0xb0] sm:$0xff]  ;;  %v106_v18 = vld [vmem:[%s2467_s1 + $0xb8] sm:$0xff] }
  0x18   :  { %1691 = vmatprep.subr.bf16.mxu0 %v1690_v8  ;;  %v115_v19 = vld [vmem:[%s2467_s1 + $0x100] sm:$0xff]  ;;  %v116_v20 = vld [vmem:[%s2467_s1 + $0x108] sm:$0xff]  ;;  %v1696_v21 = vpack.c.bf16 %v88_v16, %v87_v15  ;;  %v89_v22 = vld [vmem:[%s2467_s1 + $0x30] sm:$0xff]  ;;  %v1698_v24 = vpack.c.bf16 %v106_v18, %v105_v17 }
  0x19   :  { %v1718_v23 = vpack.c.bf16 %v116_v20, %v115_v19  ;;  %v90_v25 = vld [vmem:[%s2467_s1 + $0x38] sm:$0xff]  ;;  %v117_v26 = vld [vmem:[%s2467_s1 + $0x110] sm:$0xff]  ;;  %v107_v28 = vld [vmem:[%s2467_s1 + $0xc0] sm:$0xff] }
  0x1a   :  { %v118_v27 = vld [vmem:[%s2467_s1 + $0x118] sm:$0xff]  ;;  %v108_v29 = vld [vmem:[%s2467_s1 + $0xc8] sm:$0xff]  ;;  %v119_v31 = vld [vmem:[%s2467_s1 + $0x120] sm:$0xff]  ;;  %v1700_v33 = vpack.c.bf16 %v90_v25, %v89_v22 }
  0x1b   :  { %1693 = vmatpush3.bf16.msra.mxu0 %v1692_v13  ;;  %1719 = vmatprep.subr.bf16.mxu1 %v1718_v23  ;;  %v1722_v30 = vpack.c.bf16 %v118_v27, %v117_v26  ;;  %v120_v32 = vld [vmem:[%s2467_s1 + $0x128] sm:$0xff]  ;;  %v91_v34 = vld [vmem:[%s2467_s1 + $0x40] sm:$0xff]  ;;  %v1702_v37 = vpack.c.bf16 %v108_v29, %v107_v28  ;;  %v121_v39 = vld [vmem:[%s2467_s1 + $0x130] sm:$0xff] }
  0x1c   :  { %1695 = vmatprep.subr.bf16.mxu0 %v1694_v14  ;;  %1721 = vmatpush3.bf16.msra.mxu1 %v1718_v23  ;;  %v1726_v35 = vpack.c.bf16 %v120_v32, %v119_v31  ;;  %v60_v36 = vld [vmem:[%s2466_s0 + $0x8] sm:$0xff]  ;;  %v122_v40 = vld [vmem:[%s2467_s1 + $0x138] sm:$0xff]  ;;  %v109_v41 = vld [vmem:[%s2467_s1 + $0xd0] sm:$0xff] }
  0x1d   :  { %1723 = vmatprep.subr.bf16.mxu1 %v1722_v30  ;;  %v92_v38 = vld [vmem:[%s2467_s1 + $0x48] sm:$0xff]  ;;  %219 = vmatprep.mubr.f32.mxu0 %v60_v36  ;;  %v110_v42 = vld [vmem:[%s2467_s1 + $0xd8] sm:$0xff]  ;;  %v61_v43 = vld [vmem:[%s2466_s0 + $0x10] sm:$0xff]  ;;  %v1730_v45 = vpack.c.bf16 %v122_v40, %v121_v39 }
  0x1e   :  { %1518 = vmatprep.mubr.msk.f32.mxu1 %vm130_vm0, %v61_v43  ;;  %v1704_v44 = vpack.c.bf16 %v92_v38, %v91_v34  ;;  %v1706_v46 = vpack.c.bf16 %v110_v42, %v109_v41  ;;  %v93_v47 = vld [vmem:[%s2467_s1 + $0x50] sm:$0xff]  ;;  %v94_v48 = vld [vmem:[%s2467_s1 + $0x58] sm:$0xff]  ;;  %v111_v49 = vld [vmem:[%s2467_s1 + $0xe0] sm:$0xff] }
  0x1f   :  { %1697 = vmatpush3.bf16.msra.mxu0 %v1696_v21  ;;  %v112_v50 = vld [vmem:[%s2467_s1 + $0xe8] sm:$0xff]  ;;  %v1708_v51 = vpack.c.bf16 %v94_v48, %v93_v47  ;;  %v95_v52 = vld [vmem:[%s2467_s1 + $0x60] sm:$0xff]  ;;  %v113_v57 = vld [vmem:[%s2467_s1 + $0xf0] sm:$0xff] }
  0x20   :  { %1699 = vmatprep.subr.bf16.mxu0 %v1698_v24  ;;  %1725 = vmatpush3.bf16.msra.mxu1 %v1722_v30  ;;  %v1710_v53 = vpack.c.bf16 %v112_v50, %v111_v49  ;;  %v96_v54 = vld [vmem:[%s2467_s1 + $0x68] sm:$0xff]  ;;  %v373_v55 = vld [vmem:[%s2469_s3] sm:$0xff]  ;;  %v114_v58 = vld [vmem:[%s2467_s1 + $0xf8] sm:$0xff] }
  0x21   :  { %1727 = vmatprep.subr.bf16.mxu1 %v1726_v35  ;;  %v374_v56 = vld [vmem:[%s2469_s3 + $0x8] sm:$0xff]  ;;  %v1712_v61 = vpack.c.bf16 %v96_v54, %v95_v52  ;;  %v67_v62 = vld [vmem:[%s2466_s0 + $0x40] sm:$0xff]  ;;  %v1714_v63 = vpack.c.bf16 %v114_v58, %v113_v57  ;;  %v97_v0 = vld [vmem:[%s2467_s1 + $0x70] sm:$0xff] }
  0x22   :  { %v1734_v59 = vpack.c.bf16 %v374_v56, %v373_v55  ;;  %v64_v60 = vld [vmem:[%s2466_s0 + $0x28] sm:$0xff]  ;;  %v98_v1 = vld [vmem:[%s2467_s1 + $0x78] sm:$0xff]  ;;  %v73_v4 = vld [vmem:[%s2466_s0 + $0x70] sm:$0xff] }
  0x23   :  { %1701 = vmatpush3.bf16.msra.mxu0 %v1700_v33  ;;  %v70_v2 = vld [vmem:[%s2466_s0 + $0x58] sm:$0xff]  ;;  %v1716_v3 = vpack.c.bf16 %v98_v1, %v97_v0  ;;  %v76_v5 = vld [vmem:[%s2466_s0 + $0x88] sm:$0xff]  ;;  %v59_v6 = vld [vmem:[%s2466_s0] sm:$0xff] }
  0x24   :  { %1703 = vmatprep.subr.bf16.mxu0 %v1702_v37  ;;  %1729 = vmatpush3.bf16.msra.mxu1 %v1726_v35  ;;  %v79_v7 = vld [vmem:[%s2466_s0 + $0xa0] sm:$0xff]  ;;  %v82_v9 = vld [vmem:[%s2466_s0 + $0xb8] sm:$0xff]  ;;  %v65_v12 = vld [vmem:[%s2466_s0 + $0x30] sm:$0xff] }
  0x25   :  { %1731 = vmatprep.subr.bf16.mxu1 %v1730_v45  ;;  %v63_v8 = vld [vmem:[%s2466_s0 + $0x20] sm:$0xff]  ;;  %v62_v10 = vld [vmem:[%s2466_s0 + $0x18] sm:$0xff]  ;;  %v69_v13 = vld [vmem:[%s2466_s0 + $0x50] sm:$0xff] }
  0x26   :  { %v66_v11 = vld [vmem:[%s2466_s0 + $0x38] sm:$0xff]  ;;  %v68_v14 = vld [vmem:[%s2466_s0 + $0x48] sm:$0xff]  ;;  %v71_v16 = vld [vmem:[%s2466_s0 + $0x60] sm:$0xff] }
  0x27   :  { %1705 = vmatpush3.bf16.msra.mxu0 %v1704_v44  ;;  %v72_v15 = vld [vmem:[%s2466_s0 + $0x68] sm:$0xff]  ;;  %v75_v17 = vld [vmem:[%s2466_s0 + $0x80] sm:$0xff]  ;;  %v74_v18 = vld [vmem:[%s2466_s0 + $0x78] sm:$0xff] }
  0x28   :  { %1707 = vmatprep.subr.bf16.mxu0 %v1706_v46  ;;  %1733 = vmatpush3.bf16.msra.mxu1 %v1730_v45  ;;  %v78_v19 = vld [vmem:[%s2466_s0 + $0x98] sm:$0xff]  ;;  %v77_v20 = vld [vmem:[%s2466_s0 + $0x90] sm:$0xff]  ;;  %v80_v22 = vld [vmem:[%s2466_s0 + $0xa8] sm:$0xff] }
  0x29   :  { %1735 = vmatprep.subr.bf16.mxu1 %v1734_v59  ;;  %v81_v21 = vld [vmem:[%s2466_s0 + $0xb0] sm:$0xff]  ;;  %v376_v24 = vld [vmem:[%s2469_s3 + $0x18] sm:$0xff]  ;;  %v377_v26 = vld [vmem:[%s2469_s3 + $0x20] sm:$0xff] }
  0x2a   :  { %v375_v23 = vld [vmem:[%s2469_s3 + $0x10] sm:$0xff]  ;;  %v378_v27 = vld [vmem:[%s2469_s3 + $0x28] sm:$0xff]  ;;  %v380_v30 = vld [vmem:[%s2469_s3 + $0x38] sm:$0xff] }
  0x2b   :  { %1709 = vmatpush3.bf16.msra.mxu0 %v1708_v51  ;;  %1519 = vmatmul.mubr.msk.f32.vlgmr.msra.gmra.mrb[0].mxu1 %vm130_vm0, %v64_v60  ;;  %v1738_v25 = vpack.c.bf16 %v376_v24, %v375_v23  ;;  %v1742_v28 = vpack.c.bf16 %v378_v27, %v377_v26  ;;  %v379_v29 = vld [vmem:[%s2469_s3 + $0x30] sm:$0xff]  ;;  %v525_v32 = vld [vmem:[%s2471_s5] sm:$0xff]  ;;  %v526_v33 = vld [vmem:[%s2471_s5 + $0x8] sm:$0xff] }
  0x2c   :  { %1711 = vmatprep.subr.bf16.mxu0 %v1710_v53  ;;  %1521 = vmatprep.mubr.msk.f32.mxu1 %vm130_vm0, %v67_v62  ;;  %v1746_v31 = vpack.c.bf16 %v380_v30, %v379_v29  ;;  %v1750_v34 = vpack.c.bf16 %v526_v33, %v525_v32  ;;  %v1289_v43 = vld [vmem:[%s2468_s2] ss:$0 sm:$0xff]  ;;  %v527_v56 = vld [vmem:[%s2471_s5 + $0x10] sm:$0xff]  ;;  %v528_v57 = vld [vmem:[%s2471_s5 + $0x18] sm:$0xff] }
  0x2d   :  { %1737 = vmatpush3.bf16.msra.mxu1 %v1734_v59  ;;  %v529_v1 = vld [vmem:[%s2471_s5 + $0x20] sm:$0xff] }
  0x2e   :  { %1739 = vmatprep.subr.bf16.mxu1 %v1738_v25 }
  0x2f   :  { %1713 = vmatpush3.bf16.msra.mxu0 %v1712_v61  ;;  %1522 = vmatmul.mubr.msk.f32.gmra.mrb[2].mxu1 %vm130_vm0, %v70_v2  ;;  %v530_v2 = vld [vmem:[%s2471_s5 + $0x28] sm:$0xff] }
  0x30   :  { %1715 = vmatprep.subr.bf16.mxu0 %v1714_v63  ;;  %1524 = vmatprep.mubr.msk.f32.mxu1 %vm130_vm0, %v73_v4  ;;  %v1754_v63 = vpack.c.bf16 %v528_v57, %v527_v56  ;;  %v690_v56 = vld [vmem:[%s2473_s7 + $0x68] sm:$0xff] }
  0x31   :  { %1741 = vmatpush3.bf16.msra.mxu1 %v1738_v25 }
  0x32   :  { %1743 = vmatprep.subr.bf16.mxu1 %v1742_v28 }
  0x33   :  { %1717 = vmatpush3.bf16.msra.mxu0 %v1716_v3  ;;  %1525 = vmatmul.mubr.msk.f32.gmra.mrb[4].mxu1 %vm130_vm0, %v76_v5 }
  0x34   :  { %1527 = vmatprep.mubr.msk.f32.mxu1 %vm130_vm0, %v79_v7 }
  0x35   :  { %1745 = vmatpush3.bf16.msra.mxu1 %v1742_v28 }
  0x36   :  { %220 = vmatmul.mubr.f32.vlgmr.msra.gmra.mrb[0].mxu0 %v59_v6  ;;  %1747 = vmatprep.subr.bf16.mxu1 %v1746_v31 }
  0x37   :  { %224 = vmatprep.mubr.f32.mxu0 %v63_v8  ;;  %1528 = vmatmul.mubr.msk.f32.gmra.mrb[6].mxu1 %vm130_vm0, %v82_v9  ;;  %v1758_v8 = vpack.c.bf16 %v530_v2, %v529_v1 }
  0x39   :  { %1749 = vmatpush3.bf16.msra.mxu1 %v1746_v31 }
  0x3a   :  { %225 = vmatmul.mubr.f32.gmra.mrb[2].mxu0 %v62_v10  ;;  %1751 = vmatprep.subr.bf16.mxu1 %v1750_v34 }
  0x3b   :  { %229 = vmatprep.mubr.f32.mxu0 %v66_v11 }
  0x3e   :  { %230 = vmatmul.mubr.f32.gmra.mrb[4].mxu0 %v65_v12 }
  0x3f   :  { %234 = vmatprep.mubr.f32.mxu0 %v69_v13 }
  0x42   :  { %235 = vmatmul.mubr.f32.gmra.mrb[6].mxu0 %v68_v14 }
  0x43   :  { %239 = vmatprep.mubr.f32.mxu0 %v72_v15 }
  0x46   :  { %240 = vmatmul.mubr.f32.gmra.mrb[8].mxu0 %v71_v16 }
  0x47   :  { %244 = vmatprep.mubr.f32.mxu0 %v75_v17 }
  0x4a   :  { %245 = vmatmul.mubr.f32.gmra.mrb[10].mxu0 %v74_v18 }
  0x4b   :  { %249 = vmatprep.mubr.f32.mxu0 %v78_v19 }
  0x4e   :  { %250 = vmatmul.mubr.f32.gmra.mrb[12].mxu0 %v77_v20 }
  0x4f   :  { %254 = vmatprep.mubr.f32.mxu0 %v81_v21 }
  0x52   :  { %255 = vmatmul.mubr.f32.gmra.mrb[14].mxu0 %v80_v22 }
  0xfe   :  { %v1520_v35 = vpop.f32.mrb[0].mxu1 }
  0xff   :  { %v326_v36 = vpop.f32.mrb[1].mxu1 }
 0x102   :  { %v1523_v37 = vpop.f32.mrb[2].mxu1 }
 0x103   :  { %v336_v38 = vpop.f32.mrb[3].mxu1 }
 0x106   :  { %v1526_v39 = vpop.f32.mrb[4].mxu1 }
 0x107   :  { %v346_v41 = vpop.f32.mrb[5].mxu1 }
 0x109   :  { %v1374_v40 = vpop.f32.mrb[0].mxu0 }
 0x10a   :  { %v1375_v42 = vpop.f32.mrb[1].mxu0  ;;  %v1529_v45 = vpop.f32.mrb[6].mxu1 }
 0x10b   :  { %v1376_v44 = vadd.f32 %v1375_v42, %v1374_v40  ;;  %v356_v48 = vpop.f32.mrb[7].mxu1 }
 0x10d   :  { %v1377_v46 = vpop.f32.mrb[2].mxu0  ;;  %v222_v47 = vadd.f32 %v1376_v44, %v1289_v43  ;;  %v682_v44 = vld [vmem:[%s2473_s7 + $0x28] sm:$0xff] }
 0x10e   :  { %v1378_v49 = vpop.f32.mrb[3].mxu0 }
 0x10f   :  { %v1379_v50 = vadd.f32 %v1378_v49, %v1377_v46  ;;  %v327_v51 = vadd.f32 %v326_v36, %v222_v47  ;;  %v683_v46 = vld [vmem:[%s2473_s7 + $0x30] sm:$0xff]  ;;  %v684_v47 = vld [vmem:[%s2473_s7 + $0x38] sm:$0xff]  ;;  %v685_v49 = vld [vmem:[%s2473_s7 + $0x40] sm:$0xff] }
 0x111   :  { %v227_v52 = vadd.f32 %v1379_v50, %v1289_v43  ;;  %v365_v53 = vmax.f32 %v327_v51, 0.0  ;;  %v1380_v54 = vpop.f32.mrb[4].mxu0  ;;  %v686_v50 = vld [vmem:[%s2473_s7 + $0x48] sm:$0xff] }
 0x112   :  { %v1381_v55 = vpop.f32.mrb[5].mxu0  ;;  %v1782_v51 = vpack.c.bf16 %v686_v50, %v685_v49 }
 0x113   :  { %v332_v58 = vadd.f32 %v1520_v35, %v227_v52  ;;  %v1382_v59 = vadd.f32 %v1381_v55, %v1380_v54  ;;  %1546 = vmatprep.mubr.msk.f32.mxu1 %vm130_vm0, %v365_v53  ;;  %v532_v35 = vld [vmem:[%s2471_s5 + $0x38] sm:$0xff]  ;;  %v687_v52 = vld [vmem:[%s2473_s7 + $0x50] sm:$0xff]  ;;  %v689_v55 = vld [vmem:[%s2473_s7 + $0x60] sm:$0xff] }
 0x114   :  { %v688_v53 = vld [vmem:[%s2473_s7 + $0x58] sm:$0xff]  ;;  %v1790_v57 = vpack.c.bf16 %v690_v56, %v689_v55  ;;  %v819_v56 = vld [vmem:[#allocation2 + $0x30] sm:$0xff] }
 0x115   :  { %v366_v60 = vmax.f32 %v332_v58, 0.0  ;;  %v1383_v61 = vpop.f32.mrb[6].mxu0  ;;  %v232_v62 = vadd.f32 %v1382_v59, %v1289_v43  ;;  %v1786_v54 = vpack.c.bf16 %v688_v53, %v687_v52  ;;  %v1298_v58 = vld [vmem:[%s2470_s4] ss:$0 sm:$0xff] }
 0x116   :  { %v1384_v0 = vpop.f32.mrb[7].mxu0 }
 0x117   :  { %v1385_v3 = vadd.f32 %v1384_v0, %v1383_v61  ;;  %v337_v4 = vadd.f32 %v336_v38, %v232_v62  ;;  %1547 = vmatmul.mubr.msk.f32.vlgmr.msra.gmra.mrb[8].mxu1 %vm130_vm0, %v366_v60  ;;  %v678_v38 = vld [vmem:[%s2473_s7 + $0x8] sm:$0xff] }
 0x118   :  { %1753 = vmatpush3.bf16.msra.mxu1 %v1750_v34  ;;  %v531_v34 = vld [vmem:[%s2471_s5 + $0x30] sm:$0xff] }
 0x119   :  { %v237_v5 = vadd.f32 %v1385_v3, %v1289_v43  ;;  %v367_v6 = vmax.f32 %v337_v4, 0.0  ;;  %v1386_v7 = vpop.f32.mrb[8].mxu0  ;;  %1755 = vmatprep.subr.bf16.mxu1 %v1754_v63  ;;  %v1762_v36 = vpack.c.bf16 %v532_v35, %v531_v34 }
 0x11a   :  { %v1387_v9 = vpop.f32.mrb[9].mxu0 }
 0x11b   :  { %v342_v10 = vadd.f32 %v1523_v37, %v237_v5  ;;  %v1388_v11 = vadd.f32 %v1387_v9, %v1386_v7  ;;  %1549 = vmatprep.mubr.msk.f32.mxu1 %vm130_vm0, %v367_v6  ;;  %v677_v37 = vld [vmem:[%s2473_s7] sm:$0xff] }
 0x11c   :  { %1757 = vmatpush3.bf16.msra.mxu1 %v1754_v63  ;;  %v1766_v40 = vpack.c.bf16 %v678_v38, %v677_v37 }
 0x11d   :  { %v368_v12 = vmax.f32 %v342_v10, 0.0  ;;  %v1389_v13 = vpop.f32.mrb[10].mxu0  ;;  %v242_v14 = vadd.f32 %v1388_v11, %v1289_v43  ;;  %1759 = vmatprep.subr.bf16.mxu1 %v1758_v8 }
 0x11e   :  { %v1390_v15 = vpop.f32.mrb[11].mxu0  ;;  %1767 = vmatprep.subr.bf16.mxu0 %v1766_v40 }
 0x11f   :  { %v1391_v16 = vadd.f32 %v1390_v15, %v1389_v13  ;;  %v347_v17 = vadd.f32 %v346_v41, %v242_v14  ;;  %1550 = vmatmul.mubr.msk.f32.gmra.mrb[10].mxu1 %vm130_vm0, %v368_v12  ;;  %v680_v41 = vld [vmem:[%s2473_s7 + $0x18] sm:$0xff]  ;;  %1769 = vmatpush3.bf16.msra.mxu0 %v1766_v40 }
 0x120   :  { %1761 = vmatpush3.bf16.msra.mxu1 %v1758_v8 }
 0x121   :  { %v247_v18 = vadd.f32 %v1391_v16, %v1289_v43  ;;  %v369_v19 = vmax.f32 %v347_v17, 0.0  ;;  %v1392_v20 = vpop.f32.mrb[12].mxu0  ;;  %1763 = vmatprep.subr.bf16.mxu1 %v1762_v36 }
 0x122   :  { %v1393_v21 = vpop.f32.mrb[13].mxu0 }
 0x123   :  { %v352_v22 = vadd.f32 %v1526_v39, %v247_v18  ;;  %v1394_v23 = vadd.f32 %v1393_v21, %v1392_v20  ;;  %1552 = vmatprep.mubr.msk.f32.mxu1 %vm130_vm0, %v369_v19  ;;  %v679_v39 = vld [vmem:[%s2473_s7 + $0x10] sm:$0xff]  ;;  %v692_v20 = vld [vmem:[%s2473_s7 + $0x78] sm:$0xff] }
 0x124   :  { %1765 = vmatpush3.bf16.msra.mxu1 %v1762_v36  ;;  %v1770_v42 = vpack.c.bf16 %v680_v41, %v679_v39  ;;  %v691_v19 = vld [vmem:[%s2473_s7 + $0x70] sm:$0xff] }
 0x125   :  { %v370_v24 = vmax.f32 %v352_v22, 0.0  ;;  %v1395_v25 = vpop.f32.mrb[14].mxu0  ;;  %v252_v26 = vadd.f32 %v1394_v23, %v1289_v43  ;;  %v1794_v21 = vpack.c.bf16 %v692_v20, %v691_v19  ;;  %v813_v22 = vld [vmem:[#allocation2] sm:$0xff]  ;;  %v814_v23 = vld [vmem:[#allocation2 + $0x8] sm:$0xff] }
 0x126   :  { %v1396_v27 = vpop.f32.mrb[15].mxu0  ;;  %1771 = vmatprep.subr.bf16.mxu0 %v1770_v42 }
 0x127   :  { %v1397_v28 = vadd.f32 %v1396_v27, %v1395_v25  ;;  %v357_v29 = vadd.f32 %v356_v48, %v252_v26  ;;  %1553 = vmatmul.mubr.msk.f32.gmra.mrb[12].mxu1 %vm130_vm0, %v370_v24  ;;  %1773 = vmatpush3.bf16.msra.mxu0 %v1770_v42  ;;  %v1778_v48 = vpack.c.bf16 %v684_v47, %v683_v46  ;;  %v815_v24 = vld [vmem:[#allocation2 + $0x10] sm:$0xff]  ;;  %v816_v26 = vld [vmem:[#allocation2 + $0x18] sm:$0xff] }
 0x128   :  { %v1798_v25 = vpack.c.bf16 %v814_v23, %v813_v22  ;;  %v1802_v27 = vpack.c.bf16 %v816_v26, %v815_v24  ;;  %v976_v22 = vld [vmem:[%s2477_s11 + $0x58] sm:$0xff]  ;;  %v979_v26 = vld [vmem:[%s2477_s11 + $0x70] sm:$0xff] }
 0x129   :  { %v257_v30 = vadd.f32 %v1397_v28, %v1289_v43  ;;  %v371_v31 = vmax.f32 %v357_v29, 0.0  ;;  %v681_v43 = vld [vmem:[%s2473_s7 + $0x20] sm:$0xff]  ;;  %v818_v29 = vld [vmem:[#allocation2 + $0x28] sm:$0xff] }
 0x12a   :  { %v817_v28 = vld [vmem:[#allocation2 + $0x20] sm:$0xff]  ;;  %1799 = vmatprep.subr.bf16.mxu1 %v1798_v25 }
 0x12b   :  { %v362_v32 = vadd.f32 %v1529_v45, %v257_v30  ;;  %1555 = vmatprep.mubr.msk.f32.mxu1 %vm130_vm0, %v371_v31  ;;  %v1774_v45 = vpack.c.bf16 %v682_v44, %v681_v43  ;;  %v1806_v30 = vpack.c.bf16 %v818_v29, %v817_v28  ;;  %v1307_v31 = vld [vmem:[%s2472_s6] ss:$0 sm:$0xff] }
 0x12d   :  { %v372_v33 = vmax.f32 %v362_v32, 0.0  ;;  %1775 = vmatprep.subr.bf16.mxu0 %v1774_v45 }
 0x12e   :  { %1777 = vmatpush3.bf16.msra.mxu0 %v1774_v45 }
 0x12f   :  { %1556 = vmatmul.mubr.msk.f32.gmra.mrb[14].mxu1 %vm130_vm0, %v372_v33  ;;  %1779 = vmatprep.subr.bf16.mxu0 %v1778_v48 }
 0x132   :  { %1781 = vmatpush3.bf16.msra.mxu0 %v1778_v48 }
 0x133   :  { %1783 = vmatprep.subr.bf16.mxu0 %v1782_v51 }
 0x136   :  { %1785 = vmatpush3.bf16.msra.mxu0 %v1782_v51 }
 0x137   :  { %1787 = vmatprep.subr.bf16.mxu0 %v1786_v54 }
 0x13a   :  { %1789 = vmatpush3.bf16.msra.mxu0 %v1786_v54 }
 0x13b   :  { %1791 = vmatprep.subr.bf16.mxu0 %v1790_v57 }
 0x13e   :  { %1793 = vmatpush3.bf16.msra.mxu0 %v1790_v57  ;;  %v820_v57 = vld [vmem:[#allocation2 + $0x38] sm:$0xff] }
 0x13f   :  { %1795 = vmatprep.subr.bf16.mxu0 %v1794_v21 }
 0x142   :  { %1797 = vmatpush3.bf16.msra.mxu0 %v1794_v21  ;;  %v973_v21 = vld [vmem:[%s2477_s11 + $0x40] sm:$0xff] }
 0x1ea   :  { %v1548_v59 = vpop.f32.mrb[8].mxu1 }
 0x1eb   :  { %v484_v60 = vadd.f32 %v1548_v59, %v1298_v58  ;;  %v478_v61 = vpop.f32.mrb[9].mxu1  ;;  %v966_v59 = vld [vmem:[%s2477_s11 + $0x8] sm:$0xff] }
 0x1ec   :  { %v479_v62 = vadd.f32 %v1298_v58, %v478_v61  ;;  %v965_v61 = vld [vmem:[%s2477_s11] sm:$0xff] }
 0x1ed   :  { %v518_v0 = vmax.f32 %v484_v60, 0.0  ;;  %v969_v60 = vld [vmem:[%s2477_s11 + $0x20] sm:$0xff] }
 0x1ee   :  { %v517_v63 = vmax.f32 %v479_v62, 0.0  ;;  %v1814_v62 = vpack.c.bf16 %v969_v60, %v966_v59 }
 0x1f0   :  { %1574 = vmatprep.mubr.msk.f32.mxu1 %vm130_vm0, %v517_v63  ;;  %v968_v63 = vld [vmem:[%s2477_s11 + $0x18] sm:$0xff]  ;;  %1815 = vmatprep.subr.bf16.mxu0 %v1814_v62 }
 0x1f1   :  { %1575 = vmatmul.mubr.msk.f32.vlgmr.msra.gmra.mrb[16].mxu1 %vm130_vm0, %v518_v0  ;;  %v967_v0 = vld [vmem:[%s2477_s11 + $0x10] sm:$0xff] }
 0x1f2   :  { %v1551_v1 = vpop.f32.mrb[10].mxu1  ;;  %1801 = vmatpush3.bf16.msra.mxu1 %v1798_v25  ;;  %v1834_v25 = vpack.c.bf16 %v976_v22, %v973_v21  ;;  %v989_v21 = vld [vmem:[%s2478_s12] sm:$0x7]  ;;  %s1905_s12 = smov [#allocation5]  }
 0x1f3   :  { %v494_v2 = vadd.f32 %v1551_v1, %v1298_v58  ;;  %v488_v3 = vpop.f32.mrb[11].mxu1  ;;  %1803 = vmatprep.subr.bf16.mxu1 %v1802_v27  ;;  %v970_v1 = vld [vmem:[%s2477_s11 + $0x28] sm:$0xff]  ;;  %s1277_s7 = sshll.u32 %s1905_s12, 4  ;;  %s1278_s7 = int_to_ptr.vmem [resolvable:$true] %s1277_s7 }
 0x1f4   :  { %v489_v4 = vadd.f32 %v1298_v58, %v488_v3  ;;  %v1830_v3 = vpack.c.bf16 %v970_v1, %v967_v0  ;;  %s1875_s6 = scalar_lea.vmem %s1278_s7, 3072  ;;  %p1880_p9 = scmp.lt.s32.totalorder %s1278_s7, %s1278_s7 }
 0x1f5   :  { %v520_v6 = vmax.f32 %v494_v2, 0.0  ;;  %v1816_v2 = vpack.c.bf16 %v968_v63, %v965_v61  ;;  %p1876_p8 = scmp.ne.s32.totalorder %s1278_s7, %s1875_s6  ;;  %p1881_p10 = scmp.lt.s32.totalorder %s1875_s6, %s1875_s6 }
 0x1f6   :  { %v519_v5 = vmax.f32 %v489_v4, 0.0  ;;  %1805 = vmatpush3.bf16.msra.mxu1 %v1802_v27  ;;  %v972_v4 = vld [vmem:[%s2477_s11 + $0x38] sm:$0xff]  ;;  %v982_v27 = vld [vmem:[%s2477_s11 + $0x88] sm:$0xff] }
 0x1f7   :  { %1807 = vmatprep.subr.bf16.mxu1 %v1806_v30  ;;  %p1882_p11 = por %p1881_p10, %p1880_p9 }
 0x1f8   :  { %1577 = vmatprep.mubr.msk.f32.mxu1 %vm130_vm0, %v519_v5  ;;  %v975_v5 = vld [vmem:[%s2477_s11 + $0x50] sm:$0xff] }
 0x1f9   :  { %1578 = vmatmul.mubr.msk.f32.gmra.mrb[18].mxu1 %vm130_vm0, %v520_v6  ;;  %v971_v6 = vld [vmem:[%s2477_s11 + $0x30] sm:$0xff]  ;;  %p1883_p12 = pnand %p1882_p11, %p1876_p8 }
 0x1fa   :  { %v1554_v7 = vpop.f32.mrb[12].mxu1  ;;  %1809 = vmatpush3.bf16.msra.mxu1 %v1806_v30 }
 0x1fb   :  { %v504_v8 = vadd.f32 %v1554_v7, %v1298_v58  ;;  %v498_v9 = vpop.f32.mrb[13].mxu1  ;;  %v1818_v7 = vpack.c.bf16 %v975_v5, %v972_v4 }
 0x1fc   :  { %v499_v10 = vadd.f32 %v1298_v58, %v498_v9 }
 0x1fd   :  { %v522_v12 = vmax.f32 %v504_v8, 0.0  ;;  %v974_v8 = vld [vmem:[%s2477_s11 + $0x48] sm:$0xff] }
 0x1fe   :  { %v521_v11 = vmax.f32 %v499_v10, 0.0  ;;  %v1820_v9 = vpack.c.bf16 %v974_v8, %v971_v6  ;;  %v978_v10 = vld [vmem:[%s2477_s11 + $0x68] sm:$0xff] }
 0x200   :  { %1580 = vmatprep.mubr.msk.f32.mxu1 %vm130_vm0, %v521_v11  ;;  %v981_v11 = vld [vmem:[%s2477_s11 + $0x80] sm:$0xff] }
 0x201   :  { %1581 = vmatmul.mubr.msk.f32.gmra.mrb[20].mxu1 %vm130_vm0, %v522_v12  ;;  %v1822_v12 = vpack.c.bf16 %v981_v11, %v978_v10 }
 0x202   :  { %v1557_v13 = vpop.f32.mrb[14].mxu1 }
 0x203   :  { %v514_v14 = vadd.f32 %v1557_v13, %v1298_v58  ;;  %v508_v15 = vpop.f32.mrb[15].mxu1  ;;  %v977_v13 = vld [vmem:[%s2477_s11 + $0x60] sm:$0xff] }
 0x204   :  { %v509_v16 = vadd.f32 %v1298_v58, %v508_v15  ;;  %v1810_v58 = vpack.c.bf16 %v820_v57, %v819_v56  ;;  %v1904_v56 = vmov 0.0   ;;  %v1317_v57 = vld [vmem:[%s2476_s10] ss:$0 sm:$0xff] }
 0x205   :  { %v524_v18 = vmax.f32 %v514_v14, 0.0  ;;  %v980_v14 = vld [vmem:[%s2477_s11 + $0x78] sm:$0xff] }
 0x206   :  { %v523_v17 = vmax.f32 %v509_v16, 0.0  ;;  %1811 = vmatprep.subr.bf16.mxu1 %v1810_v58  ;;  %v1824_v15 = vpack.c.bf16 %v980_v14, %v977_v13  ;;  %v1316_v16 = vld [vmem:[%s2474_s8] ss:$0 sm:$0xff] }
 0x207   :  { %1813 = vmatpush3.bf16.msra.mxu1 %v1810_v58 }
 0x208   :  { %1583 = vmatprep.mubr.msk.f32.mxu1 %vm130_vm0, %v523_v17  ;;  %1831 = vmatprep.subr.bf16.mxu1 %v1830_v3 }
 0x209   :  { %1584 = vmatmul.mubr.msk.f32.gmra.mrb[22].mxu1 %vm130_vm0, %v524_v18 }
 0x2c4   :  { %v1576_v32 = vpop.f32.mrb[16].mxu1 }
 0x2c5   :  { %v636_v33 = vadd.f32 %v1576_v32, %v1307_v31  ;;  %v630_v34 = vpop.f32.mrb[17].mxu1 }
 0x2c6   :  { %v631_v35 = vadd.f32 %v1307_v31, %v630_v34 }
 0x2c7   :  { %v670_v37 = vmax.f32 %v636_v33, 0.0 }
 0x2c8   :  { %v669_v36 = vmax.f32 %v631_v35, 0.0 }
 0x2ca   :  { %1618 = vmatprep.mubr.f32.mxu0 %v669_v36 }
 0x2cb   :  { %1619 = vmatmul.mubr.f32.vlgmr.msra.gmra.mrb[16].mxu0 %v670_v37 }
 0x2cc   :  { %v1579_v38 = vpop.f32.mrb[18].mxu1  ;;  %1817 = vmatpush1.bf16.msra.mxu0 %v1816_v2 }
 0x2cd   :  { %v646_v39 = vadd.f32 %v1579_v38, %v1307_v31  ;;  %v640_v40 = vpop.f32.mrb[19].mxu1  ;;  %1819 = vmatprep.subr.bf16.mxu0 %v1818_v7 }
 0x2ce   :  { %v641_v41 = vadd.f32 %v1307_v31, %v640_v40 }
 0x2cf   :  { %v672_v43 = vmax.f32 %v646_v39, 0.0 }
 0x2d0   :  { %v671_v42 = vmax.f32 %v641_v41, 0.0  ;;  %1821 = vmatpush1.bf16.msra.mxu0 %v1820_v9 }
 0x2d1   :  { %1823 = vmatprep.subr.bf16.mxu0 %v1822_v12 }
 0x2d2   :  { %1621 = vmatprep.mubr.f32.mxu0 %v671_v42 }
 0x2d3   :  { %1622 = vmatmul.mubr.f32.gmra.mrb[18].mxu0 %v672_v43 }
 0x2d4   :  { %v1582_v44 = vpop.f32.mrb[20].mxu1  ;;  %1825 = vmatpush1.bf16.msra.mxu0 %v1824_v15 }
 0x2d5   :  { %v656_v45 = vadd.f32 %v1582_v44, %v1307_v31  ;;  %v650_v46 = vpop.f32.mrb[21].mxu1 }
 0x2d6   :  { %v651_v47 = vadd.f32 %v1307_v31, %v650_v46 }
 0x2d7   :  { %v674_v49 = vmax.f32 %v656_v45, 0.0 }
 0x2d8   :  { %v673_v48 = vmax.f32 %v651_v47, 0.0  ;;  %v984_v47 = vld [vmem:[%s2477_s11 + $0x98] sm:$0xff] }
 0x2da   :  { %1624 = vmatprep.mubr.f32.mxu0 %v673_v48  ;;  %v987_v48 = vld [vmem:[%s2477_s11 + $0xb0] sm:$0xff] }
 0x2db   :  { %1625 = vmatmul.mubr.f32.gmra.mrb[20].mxu0 %v674_v49  ;;  %v1826_v49 = vpack.c.bf16 %v987_v48, %v984_v47 }
 0x2dc   :  { %v1585_v50 = vpop.f32.mrb[22].mxu1 }
 0x2dd   :  { %v666_v51 = vadd.f32 %v1585_v50, %v1307_v31  ;;  %v660_v52 = vpop.f32.mrb[23].mxu1  ;;  %v983_v50 = vld [vmem:[%s2477_s11 + $0x90] sm:$0xff]  ;;  %1827 = vmatprep.subr.bf16.mxu0 %v1826_v49 }
 0x2de   :  { %v661_v53 = vadd.f32 %v1307_v31, %v660_v52  ;;  %v1838_v31 = vpack.c.bf16 %v982_v27, %v979_v26 }
 0x2df   :  { %v676_v55 = vmax.f32 %v666_v51, 0.0  ;;  %v986_v51 = vld [vmem:[%s2477_s11 + $0xa8] sm:$0xff] }
 0x2e0   :  { %v675_v54 = vmax.f32 %v661_v53, 0.0  ;;  %v1828_v52 = vpack.c.bf16 %v986_v51, %v983_v50  ;;  %v985_v53 = vld [vmem:[%s2477_s11 + $0xa0] sm:$0xff] }
 0x2e2   :  { %1627 = vmatprep.mubr.f32.mxu0 %v675_v54  ;;  %v988_v54 = vld [vmem:[%s2477_s11 + $0xb8] sm:$0xff]  ;;  %1829 = vmatpush1.bf16.msra.mxu0 %v1828_v52 }
 0x2e3   :  { %1628 = vmatmul.mubr.f32.gmra.mrb[22].mxu0 %v676_v55  ;;  %v1842_v55 = vpack.c.bf16 %v988_v54, %v985_v53 }
 0x2e4   :  { %1094 = vmatprep.mubr.f32.mxu0 %v1904_v56 }
 0x39e   :  { %v1620_v17 = vpop.f32.mrb[16].mxu0 }
 0x39f   :  { %v772_v18 = vadd.f32 %v1620_v17, %v1316_v16  ;;  %v766_v19 = vpop.f32.mrb[17].mxu0 }
 0x3a0   :  { %v767_v20 = vadd.f32 %v1316_v16, %v766_v19 }
 0x3a1   :  { %v806_v24 = vmax.f32 %v772_v18, 0.0  ;;  %v991_v18 = vlaneseq }
 0x3a2   :  { %v805_v23 = vmax.f32 %v767_v20, 0.0 }
 0x3a3   :  { %v992_v19 = vshrl.u32 %v991_v18, 7 }
 0x3a4   :  { %1646 = vmatprep.mubr.msk.f32.mxu1 %vm130_vm0, %v805_v23 }
 0x3a5   :  { %1647 = vmatmul.mubr.msk.f32.vlgmr.msra.gmra.mrb[24].mxu1 %vm130_vm0, %v806_v24  ;;  %v993_v20 = vsub.s32 0, %v992_v19  ;;  %v997_v22 = vsub.s32 1, %v992_v19  ;;  %v1001_v23 = vsub.s32 2, %v992_v19 }
 0x3a6   :  { %v1623_v28 = vpop.f32.mrb[18].mxu0  ;;  %1833 = vmatpush3.bf16.msra.mxu1 %v1830_v3 }
 0x3a7   :  { %v782_v29 = vadd.f32 %v1623_v28, %v1316_v16  ;;  %v776_v30 = vpop.f32.mrb[19].mxu0  ;;  %1835 = vmatprep.subr.bf16.mxu1 %v1834_v25  ;;  %v2416_v24 = vrot.slane %v989_v21, %v993_v20  ;;  %v2420_v26 = vrot.slane %v989_v21, %v1001_v23 }
 0x3a8   :  { %v777_v32 = vadd.f32 %v1316_v16, %v776_v30 }
 0x3a9   :  { %v808_v34 = vmax.f32 %v782_v29, 0.0 }
 0x3aa   :  { %v807_v33 = vmax.f32 %v777_v32, 0.0  ;;  %1837 = vmatpush3.bf16.msra.mxu1 %v1834_v25  ;;  %v2418_v25 = vrot.slane %v989_v21, %v997_v22 }
 0x3ab   :  { %1839 = vmatprep.subr.bf16.mxu1 %v1838_v31 }
 0x3ac   :  { %1649 = vmatprep.mubr.msk.f32.mxu1 %vm130_vm0, %v807_v33 }
 0x3ad   :  { %1650 = vmatmul.mubr.msk.f32.gmra.mrb[26].mxu1 %vm130_vm0, %v808_v34 }
 0x3ae   :  { %v1626_v35 = vpop.f32.mrb[20].mxu0  ;;  %1841 = vmatpush3.bf16.msra.mxu1 %v1838_v31 }
 0x3af   :  { %v792_v36 = vadd.f32 %v1626_v35, %v1316_v16  ;;  %v786_v37 = vpop.f32.mrb[21].mxu0  ;;  %1843 = vmatprep.subr.bf16.mxu1 %v1842_v55 }
 0x3b0   :  { %v787_v38 = vadd.f32 %v1316_v16, %v786_v37 }
 0x3b1   :  { %v810_v40 = vmax.f32 %v792_v36, 0.0 }
 0x3b2   :  { %v809_v39 = vmax.f32 %v787_v38, 0.0  ;;  %1845 = vmatpush3.bf16.msra.mxu1 %v1842_v55 }
 0x3b4   :  { %1652 = vmatprep.mubr.msk.f32.mxu1 %vm130_vm0, %v809_v39 }
 0x3b5   :  { %1653 = vmatmul.mubr.msk.f32.gmra.mrb[28].mxu1 %vm130_vm0, %v810_v40 }
 0x3b6   :  { %v1629_v41 = vpop.f32.mrb[22].mxu0 }
 0x3b7   :  { %v802_v42 = vadd.f32 %v1629_v41, %v1316_v16  ;;  %v796_v43 = vpop.f32.mrb[23].mxu0 }
 0x3b8   :  { %v797_v44 = vadd.f32 %v1316_v16, %v796_v43 }
 0x3b9   :  { %v812_v46 = vmax.f32 %v802_v42, 0.0 }
 0x3ba   :  { %v811_v45 = vmax.f32 %v797_v44, 0.0 }
 0x3bc   :  { %1655 = vmatprep.mubr.msk.f32.mxu1 %vm130_vm0, %v811_v45 }
 0x3bd   :  { %1656 = vmatmul.mubr.msk.f32.gmra.mrb[30].mxu1 %vm130_vm0, %v812_v46 }
 0x478   :  { %v1648_v58 = vpop.f32.mrb[24].mxu1 }
 0x479   :  { %v924_v59 = vadd.f32 %v1648_v58, %v1317_v57  ;;  %v918_v60 = vpop.f32.mrb[25].mxu1 }
 0x47a   :  { %v919_v61 = vadd.f32 %v1317_v57, %v918_v60 }
 0x47b   :  { %v958_v63 = vmax.f32 %v924_v59, 0.0 }
 0x47c   :  { %v957_v62 = vmax.f32 %v919_v61, 0.0 }
 0x47e   :  { %1326 = vmatmul.mubr.msk.f32.vlgmr.msra.gmra.mrb[24].mxu0 %vm130_vm0, %v957_v62  ;;  %1674 = vmatprep.mubr.msk.f32.mxu1 %vm130_vm0, %v957_v62 }
 0x47f   :  { %1675 = vmatmul.mubr.msk.f32.vlgmr.msra.gmra.mrb[32].mxu1 %vm130_vm0, %v958_v63  ;;  %1100 = vmatprep.mubr.f32.mxu0 %v1904_v56 }
 0x480   :  { %v1651_v0 = vpop.f32.mrb[26].mxu1 }
 0x481   :  { %v934_v1 = vadd.f32 %v1651_v0, %v1317_v57  ;;  %v928_v2 = vpop.f32.mrb[27].mxu1 }
 0x482   :  { %v929_v3 = vadd.f32 %v1317_v57, %v928_v2  ;;  %1327 = vmatmul.mubr.msk.f32.gmra.mrb[26].mxu0 %vm130_vm0, %v958_v63 }
 0x483   :  { %1106 = vmatprep.mubr.f32.mxu0 %v1904_v56  ;;  %v960_v5 = vmax.f32 %v934_v1, 0.0 }
 0x484   :  { %v959_v4 = vmax.f32 %v929_v3, 0.0 }
 0x486   :  { %1328 = vmatmul.mubr.msk.f32.gmra.mrb[28].mxu0 %vm130_vm0, %v959_v4  ;;  %1677 = vmatprep.mubr.msk.f32.mxu1 %vm130_vm0, %v959_v4 }
 0x487   :  { %1678 = vmatmul.mubr.msk.f32.gmra.mrb[34].mxu1 %vm130_vm0, %v960_v5  ;;  %1112 = vmatprep.mubr.f32.mxu0 %v1904_v56 }
 0x488   :  { %v1654_v6 = vpop.f32.mrb[28].mxu1 }
 0x489   :  { %v944_v7 = vadd.f32 %v1654_v6, %v1317_v57  ;;  %v938_v8 = vpop.f32.mrb[29].mxu1 }
 0x48a   :  { %v939_v9 = vadd.f32 %v1317_v57, %v938_v8  ;;  %1329 = vmatmul.mubr.msk.f32.gmra.mrb[30].mxu0 %vm130_vm0, %v960_v5 }
 0x48b   :  { %1118 = vmatprep.mubr.f32.mxu0 %v1904_v56  ;;  %v962_v11 = vmax.f32 %v944_v7, 0.0 }
 0x48c   :  { %v961_v10 = vmax.f32 %v939_v9, 0.0 }
 0x48e   :  { %1330 = vmatmul.mubr.msk.f32.gmra.mrb[32].mxu0 %vm130_vm0, %v961_v10  ;;  %1680 = vmatprep.mubr.msk.f32.mxu1 %vm130_vm0, %v961_v10 }
 0x48f   :  { %1681 = vmatmul.mubr.msk.f32.gmra.mrb[36].mxu1 %vm130_vm0, %v962_v11  ;;  %1124 = vmatprep.mubr.f32.mxu0 %v1904_v56 }
 0x490   :  { %v1657_v12 = vpop.f32.mrb[30].mxu1 }
 0x491   :  { %v954_v13 = vadd.f32 %v1657_v12, %v1317_v57  ;;  %v948_v14 = vpop.f32.mrb[31].mxu1 }
 0x492   :  { %v949_v15 = vadd.f32 %v1317_v57, %v948_v14  ;;  %1331 = vmatmul.mubr.msk.f32.gmra.mrb[34].mxu0 %vm130_vm0, %v962_v11 }
 0x493   :  { %1130 = vmatprep.mubr.f32.mxu0 %v1904_v56  ;;  %v964_v17 = vmax.f32 %v954_v13, 0.0 }
 0x494   :  { %v963_v16 = vmax.f32 %v949_v15, 0.0 }
 0x496   :  { %1332 = vmatmul.mubr.msk.f32.gmra.mrb[36].mxu0 %vm130_vm0, %v963_v16  ;;  %1683 = vmatprep.mubr.msk.f32.mxu1 %vm130_vm0, %v963_v16 }
 0x497   :  { %1684 = vmatmul.mubr.msk.f32.gmra.mrb[38].mxu1 %vm130_vm0, %v964_v17  ;;  %1136 = vmatprep.mubr.f32.mxu0 %v1904_v56 }
 0x49a   :  { %1333 = vmatmul.mubr.msk.f32.gmra.mrb[38].mxu0 %vm130_vm0, %v964_v17 }
 0x551   :  { %v1096_v27 = vpop.f32.mrb[24].mxu0 }
 0x552   :  { %v1097_v28 = vadd.f32 %v1096_v27, %v2416_v24  ;;  %v1098_v29 = vpop.f32.mrb[25].mxu0  ;;  %v1676_v30 = vpop.f32.mrb[32].mxu1 }
 0x553   :  { %v1099_v31 = vadd.f32 %v1098_v29, %v2418_v25  ;;  %v1215_v32 = vadd.f32 %v1676_v30, %v2420_v26  ;;  %v1209_v33 = vpop.f32.mrb[33].mxu1 }
 0x554   :  { %1248 = vst [vmem:[#allocation5] sm:$0xff] %v1097_v28  ;;  %v1210_v34 = vadd.f32 %v1209_v33, %v2420_v26 }
 0x555   :  { %1249 = vst [vmem:[#allocation5 + $0x8] sm:$0xff] %v1099_v31  ;;  %1253 = vst.msk [vmem:[#allocation5 + $0x28] sm:$0xff] %vm130_vm0, %v1215_v32  ;;  %v1102_v35 = vpop.f32.mrb[26].mxu0 }
 0x556   :  { %1250 = vst.msk [vmem:[#allocation5 + $0x10] sm:$0xff] %vm130_vm0, %v1210_v34  ;;  %v1103_v36 = vadd.f32 %v1102_v35, %v2416_v24  ;;  %v1104_v37 = vpop.f32.mrb[27].mxu0 }
 0x557   :  { %v1105_v38 = vadd.f32 %v1104_v37, %v2418_v25 }
 0x558   :  { %1251 = vst [vmem:[#allocation5 + $0x18] sm:$0xff] %v1103_v36 }
 0x559   :  { %1252 = vst [vmem:[#allocation5 + $0x20] sm:$0xff] %v1105_v38  ;;  %v1108_v39 = vpop.f32.mrb[28].mxu0 }
 0x55a   :  { %v1109_v40 = vadd.f32 %v1108_v39, %v2416_v24  ;;  %v1110_v41 = vpop.f32.mrb[29].mxu0  ;;  %v1679_v42 = vpop.f32.mrb[34].mxu1 }
 0x55b   :  { %v1111_v43 = vadd.f32 %v1110_v41, %v2418_v25  ;;  %v1225_v44 = vadd.f32 %v1679_v42, %v2420_v26  ;;  %v1219_v45 = vpop.f32.mrb[35].mxu1 }
 0x55c   :  { %1254 = vst [vmem:[#allocation5 + $0x30] sm:$0xff] %v1109_v40  ;;  %v1220_v46 = vadd.f32 %v1219_v45, %v2420_v26 }
 0x55d   :  { %1255 = vst [vmem:[#allocation5 + $0x38] sm:$0xff] %v1111_v43  ;;  %1259 = vst.msk [vmem:[#allocation5 + $0x58] sm:$0xff] %vm130_vm0, %v1225_v44  ;;  %v1114_v47 = vpop.f32.mrb[30].mxu0 }
 0x55e   :  { %1256 = vst.msk [vmem:[#allocation5 + $0x40] sm:$0xff] %vm130_vm0, %v1220_v46  ;;  %v1115_v48 = vadd.f32 %v1114_v47, %v2416_v24  ;;  %v1116_v49 = vpop.f32.mrb[31].mxu0 }
 0x55f   :  { %v1117_v50 = vadd.f32 %v1116_v49, %v2418_v25 }
 0x560   :  { %1257 = vst [vmem:[#allocation5 + $0x48] sm:$0xff] %v1115_v48 }
 0x561   :  { %1258 = vst [vmem:[#allocation5 + $0x50] sm:$0xff] %v1117_v50  ;;  %v1120_v51 = vpop.f32.mrb[32].mxu0 }
 0x562   :  { %v1121_v52 = vadd.f32 %v1120_v51, %v2416_v24  ;;  %v1122_v53 = vpop.f32.mrb[33].mxu0  ;;  %v1682_v54 = vpop.f32.mrb[36].mxu1 }
 0x563   :  { %v1123_v55 = vadd.f32 %v1122_v53, %v2418_v25  ;;  %v1235_v56 = vadd.f32 %v1682_v54, %v2420_v26  ;;  %v1229_v57 = vpop.f32.mrb[37].mxu1 }
 0x564   :  { %1260 = vst [vmem:[#allocation5 + $0x60] sm:$0xff] %v1121_v52  ;;  %v1230_v58 = vadd.f32 %v1229_v57, %v2420_v26 }
 0x565   :  { %1261 = vst [vmem:[#allocation5 + $0x68] sm:$0xff] %v1123_v55  ;;  %1265 = vst.msk [vmem:[#allocation5 + $0x88] sm:$0xff] %vm130_vm0, %v1235_v56  ;;  %v1126_v59 = vpop.f32.mrb[34].mxu0 }
 0x566   :  { %1262 = vst.msk [vmem:[#allocation5 + $0x70] sm:$0xff] %vm130_vm0, %v1230_v58  ;;  %v1127_v60 = vadd.f32 %v1126_v59, %v2416_v24  ;;  %v1128_v61 = vpop.f32.mrb[35].mxu0 }
 0x567   :  { %v1129_v62 = vadd.f32 %v1128_v61, %v2418_v25 }
 0x568   :  { %1263 = vst [vmem:[#allocation5 + $0x78] sm:$0xff] %v1127_v60 }
 0x569   :  { %1264 = vst [vmem:[#allocation5 + $0x80] sm:$0xff] %v1129_v62  ;;  %v1132_v63 = vpop.f32.mrb[36].mxu0 }
 0x56a   :  { %v1133_v0 = vadd.f32 %v1132_v63, %v2416_v24  ;;  %v1134_v1 = vpop.f32.mrb[37].mxu0  ;;  %v1685_v2 = vpop.f32.mrb[38].mxu1 }
 0x56b   :  { %v1135_v3 = vadd.f32 %v1134_v1, %v2418_v25  ;;  %v1245_v4 = vadd.f32 %v1685_v2, %v2420_v26  ;;  %v1239_v5 = vpop.f32.mrb[39].mxu1 }
 0x56c   :  { %1266 = vst [vmem:[#allocation5 + $0x90] sm:$0xff] %v1133_v0  ;;  %v1240_v6 = vadd.f32 %v1239_v5, %v2420_v26 }
 0x56d   :  { %1267 = vst [vmem:[#allocation5 + $0x98] sm:$0xff] %v1135_v3  ;;  %1271 = vst.msk [vmem:[#allocation5 + $0xb8] sm:$0xff] %vm130_vm0, %v1245_v4  ;;  %v1138_v7 = vpop.f32.mrb[38].mxu0 }
 0x56e   :  { %1268 = vst.msk [vmem:[#allocation5 + $0xa0] sm:$0xff] %vm130_vm0, %v1240_v6  ;;  %v1139_v8 = vadd.f32 %v1138_v7, %v2416_v24  ;;  %v1140_v9 = vpop.f32.mrb[39].mxu0 }
 0x56f   :  { %v1141_v10 = vadd.f32 %v1140_v9, %v2418_v25 }
 0x570   :  { %1269 = vst [vmem:[#allocation5 + $0xa8] sm:$0xff] %v1139_v8 }
 0x571   :  { %1270 = vst [vmem:[#allocation5 + $0xb0] sm:$0xff] %v1141_v10 }
 0x572   :  { %1886 = shalt.err (!%p1883_p12)
}
 0x573   :  { %s1887_s25 = scalar_lea.hbm %s2479_s13, 3072 }
 0x574   :  { %p1888_p13 = scmp.ne.s32.totalorder %s2479_s13, %s1887_s25  ;;  %p1891_p0 = scmp.lt.u32.totalorder %s1887_s25, %s2479_s13 }
 0x576   :  { %p1893_p1 = pnand %p1891_p0, %p1888_p13 }
 0x578   :  { %1896 = shalt.err (!%p1893_p1)
}
 0x579   :  { %s1906_s29 = smov 384   ;;  %s1907_s30 = smov 24  }
 0x57a   :  { %1283 = dma.vmem_to_hbm [thread:$0]  %s1278_s7, 3072, %s2479_s13, [#allocation4], %s1906_s29, %s1906_s29, %s1907_s30  }
 0x57b   :  { %1899 = dma.done.wait [#allocation4], 3072  }
 0x57c   :  { %1900 = vsyncadd [#allocation4], 4294964224 }
 0x57d   :  { %1287 = vsyncpa [#allocation3], 1 }
 0x57e   :  { %1288 = vsyncpa [#allocation4], 1 }

</bundles_post_ra>
